<compile_context>
chip_gen: v7x
topology: tpu7x:2x2x1
jax: 0.10.0
libtpu: 0.0.40
codegen_flags: <defaults>
</compile_context>

<pallas_src>
import string
import math

import numpy as np
import jax
import jax.numpy as jnp
from jax import lax
from jax.experimental import pallas as pl
from jax.experimental.pallas import tpu as pltpu

# --- module hyperparameters (mirroring the PyTorch script) ---
all_letters = string.ascii_letters + " .,;'"
n_letters = len(all_letters)          # 57  -> input_size
n_hidden = 128                        # hidden_size
n_categories = 18                     # output_size

IN_PAD = 64                           # letter weight rows padded 57 -> 64 (sublane multiple of 8)
OUT_PAD = 128                         # categories padded 18 -> 128 lanes
N_FUSED = n_hidden + OUT_PAD          # fused width: [hidden(128) | logits_padded(128)] = 256
NEG = -1e30                           # bias for padded logit lanes (drops out of softmax)


def rnn_seq_kernel(idx_ref, wx_ref, wh_ref, b_ref, out_ref):
    """Whole character sequence in one invocation (seq_len static, loop fully unrolled).

    Per step t:
      fused_t = Wx[idx_t, :] + h_{t-1} @ Wh + b     # one-hot x  ->  weight-row gather
      h_t     = fused_t[:, :128]                    # (no nonlinearity, per the tutorial module)
    After the loop:
      out = [ h_T | log_softmax(fused_T[:, 128:]) ]  (padded logit lanes carry -1e30 bias)
    """
    seq_len = idx_ref.shape[0]
    B = out_ref.shape[0]

    fused = jnp.zeros((B, N_FUSED), jnp.float32)          # h_0 = initHidden() = 0
    for t in range(seq_len):                              # static trip count -> fully unrolled
        h = fused[:, :n_hidden]
        x_row = wx_ref[pl.ds(idx_ref[t], 1), :]           # [1, N_FUSED]: x @ Wx via row gather
        fused = (x_row
                 + jnp.dot(h, wh_ref[...], preferred_element_type=jnp.float32)
                 + b_ref[...])

    logits = fused[:, n_hidden:]                          # [B, OUT_PAD], pad lanes ~ -1e30
    m = jnp.max(logits, axis=1, keepdims=True)
    z = logits - m
    lse = jnp.log(jnp.sum(jnp.exp(z), axis=1, keepdims=True))

    out_ref[:, :n_hidden] = fused[:, :n_hidden]           # final hidden (128-lane aligned)
    out_ref[:, n_hidden:] = z - lse                       # log-probs    (128-lane aligned)


def rnn_forward(letter_idx, wx, wh, b, batch=1):
    """Full-sequence forward. letter_idx: [seq_len] int32 letter indices (one sequence, B=1).
    Returns (log_probs [B, n_categories] for the LAST step, final hidden [B, n_hidden])."""
    out = pl.pallas_call(
        rnn_seq_kernel,
        out_shape=jax.ShapeDtypeStruct((batch, N_FUSED), jnp.float32),
        grid_spec=pltpu.PrefetchScalarGridSpec(
            num_scalar_prefetch=1,                         # letter_idx -> SMEM
            grid=(1,),                                     # single invocation, in-kernel loop
            in_specs=[
                pl.BlockSpec((IN_PAD, N_FUSED), lambda i, idx: (0, 0)),      # Wx, resident
                pl.BlockSpec((n_hidden, N_FUSED), lambda i, idx: (0, 0)),    # Wh, resident
                pl.BlockSpec((1, N_FUSED), lambda i, idx: (0, 0)),           # bias, resident
            ],
            out_specs=pl.BlockSpec((batch, N_FUSED), lambda i, idx: (0, 0)),
        ),
        compiler_params=pltpu.CompilerParams(
            dimension_semantics=("arbitrary",)),
    )(letter_idx, wx, wh, b)

    log_probs = out[:, n_hidden:n_hidden + n_categories]
    hidden = out[:, :n_hidden]
    return log_probs, hidden


# --- parameter construction (nn.Linear-style init, then fuse/pad for the kernel) ---
def init_linear(key, in_features, out_features):
    """PyTorch nn.Linear init: W [out, in], b [out] ~ U(-1/sqrt(in), 1/sqrt(in))."""
    kw, kb = jax.random.split(key)
    bound = 1.0 / math.sqrt(in_features)
    w = jax.random.uniform(kw, (out_features, in_features), jnp.float32,
                           minval=-bound, maxval=bound)
    bb = jax.random.uniform(kb, (out_features,), jnp.float32,
                            minval=-bound, maxval=bound)
    return w, bb


def fuse_params(w_i2h, b_i2h, w_i2o, b_i2o):
    """Build Wx [IN_PAD, 256], Wh [128, 256], b [1, 256] for the fused kernel."""
    wx = np.zeros((IN_PAD, N_FUSED), np.float32)
    wh = np.zeros((n_hidden, N_FUSED), np.float32)
    b = np.full((1, N_FUSED), NEG, np.float32)

    w_i2h = np.asarray(w_i2h)   # [128, 185]
    w_i2o = np.asarray(w_i2o)   # [18, 185]

    wx[:n_letters, :n_hidden] = w_i2h[:, :n_letters].T
    wx[:n_letters, n_hidden:n_hidden + n_categories] = w_i2o[:, :n_letters].T
    wh[:, :n_hidden] = w_i2h[:, n_letters:].T
    wh[:, n_hidden:n_hidden + n_categories] = w_i2o[:, n_letters:].T
    b[0, :n_hidden] = np.asarray(b_i2h)
    b[0, n_hidden:n_hidden + n_categories] = np.asarray(b_i2o)
    return jnp.asarray(wx), jnp.asarray(wh), jnp.asarray(b)


# --- host-side glue mirroring letterToIndex / lineToTensor ---
def letter_to_index(letter):
    return all_letters.find(letter)


def line_to_indices(line):
    """Kernel input: just the letter indices (the one-hot is exploited as a row gather)."""
    return jnp.asarray(np.array([letter_to_index(c) for c in line], dtype=np.int32))


def line_to_tensor(line):
    """Reference-only: the tutorial's one-hot [seq, 1, n_letters] tensor."""
    t = np.zeros((len(line), 1, n_letters), dtype=np.float32)
    for li, letter in enumerate(line):
        t[li, 0, letter_to_index(letter)] = 1.0
    return jnp.asarray(t)


# --- pure-JAX reference (mirrors the PyTorch forward exactly) ---
def rnn_reference(x_seq, w_i2h, b_i2h, w_i2o, b_i2o):
    h = jnp.zeros((x_seq.shape[1], n_hidden), jnp.float32)
    out = None
    for t in range(x_seq.shape[0]):
        combined = jnp.concatenate([x_seq[t], h], axis=1)
        h = combined @ w_i2h.T + b_i2h
        logits = combined @ w_i2o.T + b_i2o
        out = jax.nn.log_softmax(logits, axis=1)
    return out, h


if __name__ == "__main__":
    key = jax.random.PRNGKey(0)
    k1, k2 = jax.random.split(key)

    in_plus_hid = n_letters + n_hidden
    w_i2h, b_i2h = init_linear(k1, in_plus_hid, n_hidden)
    w_i2o, b_i2o = init_linear(k2, in_plus_hid, n_categories)
    wx, wh, b = fuse_params(w_i2h, b_i2h, w_i2o, b_i2o)

    # input = lineToTensor('Albert')  -> seq_len=6, batch=1
    line = "Albert"
    letter_idx = line_to_indices(line)      # [6] int32  (kernel input)
    x_seq = line_to_tensor(line)            # [6, 1, 57] one-hot (reference only)

    output, hidden = jax.jit(rnn_forward)(letter_idx, wx, wh, b)
    output = jax.block_until_ready(output)
    hidden = jax.block_until_ready(hidden)

    assert output.shape == (1, n_categories)
    assert hidden.shape == (1, n_hidden)
    # log-softmax rows must (approximately) exponentiate-sum to 1
    assert jnp.allclose(jnp.sum(jnp.exp(output), axis=1), 1.0, atol=1e-4)

    # check against the pure-JAX reference of the PyTorch forward
    ref_out, ref_hid = rnn_reference(x_seq, w_i2h, b_i2h, w_i2o, b_i2o)
    np.testing.assert_allclose(np.asarray(output), np.asarray(ref_out), atol=2e-4, rtol=2e-4)
    np.testing.assert_allclose(np.asarray(hidden), np.asarray(ref_hid), atol=2e-4, rtol=2e-4)

    print("KERNEL_OK")
</pallas_src>

<mosaic_0001>
module attributes {stable_mosaic.version = 11 : i64} {
  func.func @rnn_seq_kernel(%arg0: i32, %arg1: memref<6xi32, #tpu.memory_space<smem>>, %arg2: memref<64x256xf32, #tpu.memory_space<vmem>>, %arg3: memref<128x256xf32, #tpu.memory_space<vmem>>, %arg4: memref<1x256xf32, #tpu.memory_space<vmem>>, %arg5: memref<1x256xf32, #tpu.memory_space<vmem>>) attributes {dimension_semantics = [#tpu.dimension_semantics<arbitrary>], iteration_bounds = array<i64: 1>, scalar_prefetch = 1 : i64, scratch_operands = 0 : i64, tpu.core_type = #tpu.core_type<tc>, window_params = [{pipeline_mode = #tpu.pipeline_mode<synchronous>, transform_indices = @transform_0, window_bounds = array<i64: 64, 256>}, {pipeline_mode = #tpu.pipeline_mode<synchronous>, transform_indices = @transform_1, window_bounds = array<i64: 128, 256>}, {pipeline_mode = #tpu.pipeline_mode<synchronous>, transform_indices = @transform_2, window_bounds = array<i64: 1, 256>}, {pipeline_mode = #tpu.pipeline_mode<synchronous>, transform_indices = @transform_3, window_bounds = array<i64: 1, 256>}]} {
    %cst = arith.constant 0.000000e+00 : f32
    %0 = vector.broadcast %cst : f32 to vector<1x256xf32>
    %1 = vector.extract_strided_slice %0 {offsets = [0, 0], sizes = [1, 128], strides = [1, 1]} : vector<1x256xf32> to vector<1x128xf32>
    %c0 = arith.constant 0 : index
    %2 = memref.load %arg1[%c0] : memref<6xi32, #tpu.memory_space<smem>>
    %3 = arith.index_cast %2 : i32 to index
    %c0_0 = arith.constant 0 : index
    %4 = vector.load %arg2[%3, %c0_0] : memref<64x256xf32, #tpu.memory_space<vmem>>, vector<1x256xf32>
    %c0_1 = arith.constant 0 : index
    %c0_2 = arith.constant 0 : index
    %5 = vector.load %arg3[%c0_1, %c0_2] : memref<128x256xf32, #tpu.memory_space<vmem>>, vector<128x256xf32>
    %cst_3 = arith.constant dense<0.000000e+00> : vector<1x256xf32>
    %6 = tpu.matmul %1, %5, %cst_3 {dimension_numbers = #tpu.dot_dimension_numbers<[1], [0], [0], [1], [0, 0, 1, 1], [], []>} : vector<1x128xf32>, vector<128x256xf32>, vector<1x256xf32> -> vector<1x256xf32>
    %7 = arith.addf %4, %6 : vector<1x256xf32>
    %c0_4 = arith.constant 0 : index
    %c0_5 = arith.constant 0 : index
    %8 = vector.load %arg4[%c0_4, %c0_5] : memref<1x256xf32, #tpu.memory_space<vmem>>, vector<1x256xf32>
    %9 = arith.addf %7, %8 : vector<1x256xf32>
    %10 = vector.extract_strided_slice %9 {offsets = [0, 0], sizes = [1, 128], strides = [1, 1]} : vector<1x256xf32> to vector<1x128xf32>
    %c1 = arith.constant 1 : index
    %11 = memref.load %arg1[%c1] : memref<6xi32, #tpu.memory_space<smem>>
    %12 = arith.index_cast %11 : i32 to index
    %c0_6 = arith.constant 0 : index
    %13 = vector.load %arg2[%12, %c0_6] : memref<64x256xf32, #tpu.memory_space<vmem>>, vector<1x256xf32>
    %c0_7 = arith.constant 0 : index
    %c0_8 = arith.constant 0 : index
    %14 = vector.load %arg3[%c0_7, %c0_8] : memref<128x256xf32, #tpu.memory_space<vmem>>, vector<128x256xf32>
    %cst_9 = arith.constant dense<0.000000e+00> : vector<1x256xf32>
    %15 = tpu.matmul %10, %14, %cst_9 {dimension_numbers = #tpu.dot_dimension_numbers<[1], [0], [0], [1], [0, 0, 1, 1], [], []>} : vector<1x128xf32>, vector<128x256xf32>, vector<1x256xf32> -> vector<1x256xf32>
    %16 = arith.addf %13, %15 : vector<1x256xf32>
    %c0_10 = arith.constant 0 : index
    %c0_11 = arith.constant 0 : index
    %17 = vector.load %arg4[%c0_10, %c0_11] : memref<1x256xf32, #tpu.memory_space<vmem>>, vector<1x256xf32>
    %18 = arith.addf %16, %17 : vector<1x256xf32>
    %19 = vector.extract_strided_slice %18 {offsets = [0, 0], sizes = [1, 128], strides = [1, 1]} : vector<1x256xf32> to vector<1x128xf32>
    %c2 = arith.constant 2 : index
    %20 = memref.load %arg1[%c2] : memref<6xi32, #tpu.memory_space<smem>>
    %21 = arith.index_cast %20 : i32 to index
    %c0_12 = arith.constant 0 : index
    %22 = vector.load %arg2[%21, %c0_12] : memref<64x256xf32, #tpu.memory_space<vmem>>, vector<1x256xf32>
    %c0_13 = arith.constant 0 : index
    %c0_14 = arith.constant 0 : index
    %23 = vector.load %arg3[%c0_13, %c0_14] : memref<128x256xf32, #tpu.memory_space<vmem>>, vector<128x256xf32>
    %cst_15 = arith.constant dense<0.000000e+00> : vector<1x256xf32>
    %24 = tpu.matmul %19, %23, %cst_15 {dimension_numbers = #tpu.dot_dimension_numbers<[1], [0], [0], [1], [0, 0, 1, 1], [], []>} : vector<1x128xf32>, vector<128x256xf32>, vector<1x256xf32> -> vector<1x256xf32>
    %25 = arith.addf %22, %24 : vector<1x256xf32>
    %c0_16 = arith.constant 0 : index
    %c0_17 = arith.constant 0 : index
    %26 = vector.load %arg4[%c0_16, %c0_17] : memref<1x256xf32, #tpu.memory_space<vmem>>, vector<1x256xf32>
    %27 = arith.addf %25, %26 : vector<1x256xf32>
    %28 = vector.extract_strided_slice %27 {offsets = [0, 0], sizes = [1, 128], strides = [1, 1]} : vector<1x256xf32> to vector<1x128xf32>
    %c3 = arith.constant 3 : index
    %29 = memref.load %arg1[%c3] : memref<6xi32, #tpu.memory_space<smem>>
    %30 = arith.index_cast %29 : i32 to index
    %c0_18 = arith.constant 0 : index
    %31 = vector.load %arg2[%30, %c0_18] : memref<64x256xf32, #tpu.memory_space<vmem>>, vector<1x256xf32>
    %c0_19 = arith.constant 0 : index
    %c0_20 = arith.constant 0 : index
    %32 = vector.load %arg3[%c0_19, %c0_20] : memref<128x256xf32, #tpu.memory_space<vmem>>, vector<128x256xf32>
    %cst_21 = arith.constant dense<0.000000e+00> : vector<1x256xf32>
    %33 = tpu.matmul %28, %32, %cst_21 {dimension_numbers = #tpu.dot_dimension_numbers<[1], [0], [0], [1], [0, 0, 1, 1], [], []>} : vector<1x128xf32>, vector<128x256xf32>, vector<1x256xf32> -> vector<1x256xf32>
    %34 = arith.addf %31, %33 : vector<1x256xf32>
    %c0_22 = arith.constant 0 : index
    %c0_23 = arith.constant 0 : index
    %35 = vector.load %arg4[%c0_22, %c0_23] : memref<1x256xf32, #tpu.memory_space<vmem>>, vector<1x256xf32>
    %36 = arith.addf %34, %35 : vector<1x256xf32>
    %37 = vector.extract_strided_slice %36 {offsets = [0, 0], sizes = [1, 128], strides = [1, 1]} : vector<1x256xf32> to vector<1x128xf32>
    %c4 = arith.constant 4 : index
    %38 = memref.load %arg1[%c4] : memref<6xi32, #tpu.memory_space<smem>>
    %39 = arith.index_cast %38 : i32 to index
    %c0_24 = arith.constant 0 : index
    %40 = vector.load %arg2[%39, %c0_24] : memref<64x256xf32, #tpu.memory_space<vmem>>, vector<1x256xf32>
    %c0_25 = arith.constant 0 : index
    %c0_26 = arith.constant 0 : index
    %41 = vector.load %arg3[%c0_25, %c0_26] : memref<128x256xf32, #tpu.memory_space<vmem>>, vector<128x256xf32>
    %cst_27 = arith.constant dense<0.000000e+00> : vector<1x256xf32>
    %42 = tpu.matmul %37, %41, %cst_27 {dimension_numbers = #tpu.dot_dimension_numbers<[1], [0], [0], [1], [0, 0, 1, 1], [], []>} : vector<1x128xf32>, vector<128x256xf32>, vector<1x256xf32> -> vector<1x256xf32>
    %43 = arith.addf %40, %42 : vector<1x256xf32>
    %c0_28 = arith.constant 0 : index
    %c0_29 = arith.constant 0 : index
    %44 = vector.load %arg4[%c0_28, %c0_29] : memref<1x256xf32, #tpu.memory_space<vmem>>, vector<1x256xf32>
    %45 = arith.addf %43, %44 : vector<1x256xf32>
    %46 = vector.extract_strided_slice %45 {offsets = [0, 0], sizes = [1, 128], strides = [1, 1]} : vector<1x256xf32> to vector<1x128xf32>
    %c5 = arith.constant 5 : index
    %47 = memref.load %arg1[%c5] : memref<6xi32, #tpu.memory_space<smem>>
    %48 = arith.index_cast %47 : i32 to index
    %c0_30 = arith.constant 0 : index
    %49 = vector.load %arg2[%48, %c0_30] : memref<64x256xf32, #tpu.memory_space<vmem>>, vector<1x256xf32>
    %c0_31 = arith.constant 0 : index
    %c0_32 = arith.constant 0 : index
    %50 = vector.load %arg3[%c0_31, %c0_32] : memref<128x256xf32, #tpu.memory_space<vmem>>, vector<128x256xf32>
    %cst_33 = arith.constant dense<0.000000e+00> : vector<1x256xf32>
    %51 = tpu.matmul %46, %50, %cst_33 {dimension_numbers = #tpu.dot_dimension_numbers<[1], [0], [0], [1], [0, 0, 1, 1], [], []>} : vector<1x128xf32>, vector<128x256xf32>, vector<1x256xf32> -> vector<1x256xf32>
    %52 = arith.addf %49, %51 : vector<1x256xf32>
    %c0_34 = arith.constant 0 : index
    %c0_35 = arith.constant 0 : index
    %53 = vector.load %arg4[%c0_34, %c0_35] : memref<1x256xf32, #tpu.memory_space<vmem>>, vector<1x256xf32>
    %54 = arith.addf %52, %53 : vector<1x256xf32>
    %55 = vector.extract_strided_slice %54 {offsets = [0, 128], sizes = [1, 128], strides = [1, 1]} : vector<1x256xf32> to vector<1x128xf32>
    %cst_36 = arith.constant dense<0xFF800000> : vector<1xf32>
    %56 = vector.multi_reduction <maximumf>, %55, %cst_36 [1] : vector<1x128xf32> to vector<1xf32>
    %57 = vector.shape_cast %56 : vector<1xf32> to vector<1x1xf32>
    %58 = vector.broadcast %57 : vector<1x1xf32> to vector<1x128xf32>
    %59 = arith.subf %55, %58 : vector<1x128xf32>
    %60 = math.exp %59 : vector<1x128xf32>
    %cst_37 = arith.constant dense<0.000000e+00> : vector<1xf32>
    %61 = vector.multi_reduction <add>, %60, %cst_37 [1] : vector<1x128xf32> to vector<1xf32>
    %62 = vector.shape_cast %61 : vector<1xf32> to vector<1x1xf32>
    %63 = math.log %62 : vector<1x1xf32>
    %64 = vector.extract_strided_slice %54 {offsets = [0, 0], sizes = [1, 128], strides = [1, 1]} : vector<1x256xf32> to vector<1x128xf32>
    %c0_38 = arith.constant 0 : index
    %c0_39 = arith.constant 0 : index
    %65 = vector.load %arg5[%c0_38, %c0_39] : memref<1x256xf32, #tpu.memory_space<vmem>>, vector<1x128xf32>
    tpu.vector_store %arg5[%c0_38, %c0_39], %64 {strides = array<i32>} : memref<1x256xf32, #tpu.memory_space<vmem>>, vector<1x128xf32>,
    %66 = vector.broadcast %63 : vector<1x1xf32> to vector<1x128xf32>
    %67 = arith.subf %59, %66 : vector<1x128xf32>
    %c0_40 = arith.constant 0 : index
    %c128 = arith.constant 128 : index
    %68 = vector.load %arg5[%c0_40, %c128] : memref<1x256xf32, #tpu.memory_space<vmem>>, vector<1x128xf32>
    tpu.vector_store %arg5[%c0_40, %c128], %67 {strides = array<i32>} : memref<1x256xf32, #tpu.memory_space<vmem>>, vector<1x128xf32>,
    return
  }
  func.func @transform_0(%arg0: i32, %arg1: memref<6xi32, #tpu.memory_space<smem>>) -> (i32, i32) {
    %c0_i32 = arith.constant 0 : i32
    %c0_i32_0 = arith.constant 0 : i32
    %c0_i32_1 = arith.constant 0 : i32
    return %c0_i32, %c0_i32_0 : i32, i32
  }
  func.func @transform_1(%arg0: i32, %arg1: memref<6xi32, #tpu.memory_space<smem>>) -> (i32, i32) {
    %c0_i32 = arith.constant 0 : i32
    %c0_i32_0 = arith.constant 0 : i32
    %c0_i32_1 = arith.constant 0 : i32
    return %c0_i32, %c0_i32_0 : i32, i32
  }
  func.func @transform_2(%arg0: i32, %arg1: memref<6xi32, #tpu.memory_space<smem>>) -> (i32, i32) {
    %c0_i32 = arith.constant 0 : i32
    %c0_i32_0 = arith.constant 0 : i32
    %c0_i32_1 = arith.constant 0 : i32
    return %c0_i32, %c0_i32_0 : i32, i32
  }
  func.func @transform_3(%arg0: i32, %arg1: memref<6xi32, #tpu.memory_space<smem>>) -> (i32, i32) {
    %c0_i32 = arith.constant 0 : i32
    %c0_i32_0 = arith.constant 0 : i32
    %c0_i32_1 = arith.constant 0 : i32
    return %c0_i32, %c0_i32_0 : i32, i32
  }
}

</mosaic_0001>

<bundles_post_ra>
// kernel: rnn_forward.1
= control target key start
LH: loop header
LB: loop body
LE: loop exit
PB: predicated region body
PF: predicated region fallthrough
CT: control target
= control target key end

     0   :  { %s1271_s0 = inlined_call_operand.hbm [shape: s32[6], index: 0, kind: input, shape index: {}]   ;;  %s1272_s1 = inlined_call_operand.hbm [shape: f32[64,256], index: 1, kind: input, shape index: {}]   ;;  %s1273_s2 = inlined_call_operand.hbm [shape: f32[128,256], index: 2, kind: input, shape index: {}]   ;;  %s1274_s3 = inlined_call_operand.vmem [shape: f32[1,256], index: 3, kind: input, shape index: {}]   ;;  %s1275_s4 = inlined_call_operand.vmem [shape: f32[1,256], index: 4, kind: output, shape index: {}]  }
   0x1   :  { %s963_s17 = scalar_lea.hbm %s1271_s0, 16 }
   0x2   :  { %p964_p0 = scmp.ne.s32.totalorder %s1271_s0, %s963_s17  ;;  %p967_p1 = scmp.lt.u32.totalorder %s963_s17, %s1271_s0 }
   0x4   :  { %p969_p2 = pnand %p967_p1, %p964_p0 }
   0x6   :  { %972 = shalt.err (!%p969_p2)  }
   0x7   :  { %s1023_s22 = smov [#allocation3]  }
   0x8   :  { %10 = dma.hbm_to_smem %s1271_s0, 16, %s1023_s22, [#allocation2] }
   0x9   :  { %1017 = dma.done.wait [#allocation2], 16 }
   0xa   :  { %1018 = vsyncadd [#allocation2], 4294967280 }
   0xb   :  { %12 = sfence }
   0xc   :  { %13 = vsyncpa [#allocation5], 0 }
   0xd   :  { %14 = vsyncpa [#allocation7], 0  ;;  %s1024_s25 = smov [#allocation4]   ;;  %s973_s29 = scalar_lea.hbm %s1272_s1, 2048 }
   0xe   :  { %s20_s26 = sshll.u32 %s1024_s25, 4  ;;  %p974_p3 = scmp.ne.s32.totalorder %s1272_s1, %s973_s29  ;;  %s21_s26 = int_to_ptr.vmem [resolvable:$true] %s20_s26 }
   0xf   :  { %p977_p4 = scmp.lt.u32.totalorder %s973_s29, %s1272_s1 }
  0x11   :  { %p979_p5 = pnand %p977_p4, %p974_p3 }
  0x13   :  { %982 = shalt.err (!%p979_p5)
}
  0x14   :  { %s983_s0 = scalar_lea.vmem %s21_s26, 2048  ;;  %p988_p7 = scmp.lt.s32.totalorder %s21_s26, %s21_s26 }
  0x15   :  { %p984_p6 = scmp.ne.s32.totalorder %s21_s26, %s983_s0  ;;  %p989_p8 = scmp.lt.s32.totalorder %s983_s0, %s983_s0 }
  0x17   :  { %p990_p9 = por %p989_p8, %p988_p7 }
  0x19   :  { %p991_p10 = pnand %p990_p9, %p984_p6 }
  0x1b   :  { %994 = shalt.err (!%p991_p10)
}
  0x1c   :  { %s1025_s8 = smov 256   ;;  %s1026_s9 = smov 16  }
  0x1d   :  { %26 = dma.hbm_to_vmem [thread:$0]  %s1272_s1, 2048, %s21_s26, [#allocation5], %s1025_s8, %s1025_s8, %s1026_s9  }
  0x1e   :  { %s1027_s12 = smov [#allocation6]   ;;  %s995_s16 = scalar_lea.hbm %s1273_s2, 4096 }
  0x1f   :  { %s32_s13 = sshll.u32 %s1027_s12, 4  ;;  %p996_p11 = scmp.ne.s32.totalorder %s1273_s2, %s995_s16  ;;  %s33_s13 = int_to_ptr.vmem [resolvable:$true] %s32_s13 }
  0x20   :  { %p999_p12 = scmp.lt.u32.totalorder %s995_s16, %s1273_s2 }
  0x22   :  { %p1001_p13 = pnand %p999_p12, %p996_p11 }
  0x24   :  { %1004 = shalt.err (!%p1001_p13)
}
  0x25   :  { %s1005_s21 = scalar_lea.vmem %s33_s13, 4096  ;;  %p1010_p1 = scmp.lt.s32.totalorder %s33_s13, %s33_s13 }
  0x26   :  { %p1006_p0 = scmp.ne.s32.totalorder %s33_s13, %s1005_s21  ;;  %p1011_p2 = scmp.lt.s32.totalorder %s1005_s21, %s1005_s21 }
  0x28   :  { %p1012_p3 = por %p1011_p2, %p1010_p1 }
  0x2a   :  { %p1013_p4 = pnand %p1012_p3, %p1006_p0 }
  0x2c   :  { %1016 = shalt.err (!%p1013_p4)
}
  0x2d   :  { %38 = dma.hbm_to_vmem [thread:$0]  %s1273_s2, 4096, %s33_s13, [#allocation7], %s1025_s8, %s1025_s8, %s1026_s9  }
  0x2e   :  { %1019 = dma.done.wait [#allocation5], 2048  }
  0x2f   :  { %1020 = vsyncadd [#allocation5], 4294965248 }
  0x30   :  { %1021 = dma.done.wait [#allocation7], 4096  }
  0x31   :  { %1022 = vsyncadd [#allocation7], 4294963200  ;;  %v1028_v0 = vmov 0.0   ;;  %v58_v1 = vld [vmem:[#allocation6 + $0x8] sm:$0xff]  ;;  %v60_v2 = vld [vmem:[#allocation6 + $0x18] sm:$0xff]  ;;  %s47_s2 = sld [smem:[#allocation3]]  ;;  %v166_v51 = vlaneseq }
  0x32   :  { %153 = vmatprep.mubr.f32.mxu0 %v1028_v0  ;;  %255 = vmatprep.mubr.f32.mxu1 %v1028_v0  ;;  %v57_v3 = vld [vmem:[#allocation6] sm:$0xff]  ;;  %v1093_v4 = vpack.c.bf16 %v60_v2, %v58_v1  ;;  %v59_v5 = vld [vmem:[#allocation6 + $0x10] sm:$0xff]  ;;  %v62_v6 = vld [vmem:[#allocation6 + $0x28] sm:$0xff]  ;;  %v1029_v49 = vmov 1966171168   ;;  %s742_s8 = sld [smem:[#allocation3 + $0x2]] }
  0x33   :  { %v64_v7 = vld [vmem:[#allocation6 + $0x38] sm:$0xff]  ;;  %v1095_v8 = vpack.c.bf16 %v59_v5, %v57_v3  ;;  %v61_v10 = vld [vmem:[#allocation6 + $0x20] sm:$0xff]  ;;  %v63_v11 = vld [vmem:[#allocation6 + $0x30] sm:$0xff]  ;;  %v164_v50 = vunpack.c.l.s4 %v1029_v49  ;;  %v1178_v53 = vshrl.u32 %v166_v51, 7  ;;  %s745_s14 = sld [smem:[#allocation3 + $0x3]]  ;;  %s748_s20 = sld [smem:[#allocation3 + $0x4]] }
  0x34   :  { %v1097_v9 = vpack.c.bf16 %v64_v7, %v62_v6  ;;  %v66_v12 = vld [vmem:[#allocation6 + $0x48] sm:$0xff]  ;;  %761 = vmatprep.subr.bf16.mxu0 %v1093_v4  ;;  %v68_v13 = vld [vmem:[#allocation6 + $0x58] sm:$0xff]  ;;  %793 = vmatprep.subr.bf16.mxu1 %v1093_v4  ;;  %v1102_v14 = vpack.c.bf16 %v63_v11, %v61_v10  ;;  %v65_v16 = vld [vmem:[#allocation6 + $0x40] sm:$0xff]  ;;  %vm1256_vm0 = vcmp.lt.s32.totalorder %v166_v51, 128  ;;  %vm692_vm1 = vcmask 1040384  }
  0x35   :  { %763 = vmatpush1.bf16.msra.mxu0 %v1095_v8  ;;  %795 = vmatpush1.bf16.msra.mxu1 %v1095_v8  ;;  %v1106_v15 = vpack.c.bf16 %v68_v13, %v66_v12  ;;  %v67_v17 = vld [vmem:[#allocation6 + $0x50] sm:$0xff]  ;;  %v70_v18 = vld [vmem:[#allocation6 + $0x68] sm:$0xff]  ;;  %v72_v19 = vld [vmem:[#allocation6 + $0x78] sm:$0xff]  ;;  %v165_v52 = vunpack.c.0.s8 %v164_v50 }
  0x36   :  { %765 = vmatprep.subr.bf16.mxu0 %v1097_v9  ;;  %797 = vmatprep.subr.bf16.mxu1 %v1097_v9  ;;  %v1110_v20 = vpack.c.bf16 %v67_v17, %v65_v16  ;;  %v1114_v21 = vpack.c.bf16 %v72_v19, %v70_v18  ;;  %v69_v22 = vld [vmem:[#allocation6 + $0x60] sm:$0xff]  ;;  %v71_v23 = vld [vmem:[#allocation6 + $0x70] sm:$0xff]  ;;  %v74_v24 = vld [vmem:[#allocation6 + $0x88] sm:$0xff] }
  0x37   :  { %v76_v25 = vld [vmem:[#allocation6 + $0x98] sm:$0xff]  ;;  %v1118_v26 = vpack.c.bf16 %v71_v23, %v69_v22  ;;  %v73_v28 = vld [vmem:[#allocation6 + $0x80] sm:$0xff]  ;;  %v75_v29 = vld [vmem:[#allocation6 + $0x90] sm:$0xff]  ;;  %s48_s23 = sshra.s32 %s47_s2, 3  ;;  %s51_s24 = sand.u32 7, %s47_s2  ;;  %v1181_v55 = vsub.s32 %v165_v52, %v1178_v53 }
  0x38   :  { %v1122_v27 = vpack.c.bf16 %v76_v25, %v74_v24  ;;  %v78_v30 = vld [vmem:[#allocation6 + $0xa8] sm:$0xff]  ;;  %v80_v31 = vld [vmem:[#allocation6 + $0xb8] sm:$0xff]  ;;  %v1126_v32 = vpack.c.bf16 %v75_v29, %v73_v28  ;;  %v77_v34 = vld [vmem:[#allocation6 + $0xa0] sm:$0xff]  ;;  %s754_s25 = sshll.u32 %s48_s23, 4  ;;  %s283_s9 = sshra.s32 %s742_s8, 3 }
  0x39   :  { %767 = vmatpush1.bf16.msra.mxu0 %v1102_v14  ;;  %799 = vmatpush1.bf16.msra.mxu1 %v1102_v14  ;;  %v1130_v33 = vpack.c.bf16 %v80_v31, %v78_v30  ;;  %v79_v35 = vld [vmem:[#allocation6 + $0xb0] sm:$0xff]  ;;  %v82_v36 = vld [vmem:[#allocation6 + $0xc8] sm:$0xff]  ;;  %v84_v37 = vld [vmem:[#allocation6 + $0xd8] sm:$0xff]  ;;  %s54_s26 = sadd.s32 %s754_s25, %s51_s24  ;;  %s286_s10 = sand.u32 7, %s742_s8 }
  0x3a   :  { %769 = vmatprep.subr.bf16.mxu0 %v1106_v15  ;;  %801 = vmatprep.subr.bf16.mxu1 %v1106_v15  ;;  %v1134_v38 = vpack.c.bf16 %v79_v35, %v77_v34  ;;  %v1138_v39 = vpack.c.bf16 %v84_v37, %v82_v36  ;;  %v81_v40 = vld [vmem:[#allocation6 + $0xc0] sm:$0xff]  ;;  %v83_v41 = vld [vmem:[#allocation6 + $0xd0] sm:$0xff]  ;;  %v86_v42 = vld [vmem:[#allocation6 + $0xe8] sm:$0xff]  ;;  %s55_s27 = scalar_lea.vmem [#allocation4], %s54_s26  ;;  %s756_s11 = sshll.u32 %s283_s9, 4 }
  0x3b   :  { %v88_v43 = vld [vmem:[#allocation6 + $0xf8] sm:$0xff]  ;;  %v1142_v44 = vpack.c.bf16 %v83_v41, %v81_v40  ;;  %v85_v46 = vld [vmem:[#allocation6 + $0xe0] sm:$0xff]  ;;  %v87_v47 = vld [vmem:[#allocation6 + $0xf0] sm:$0xff]  ;;  %s289_s12 = sadd.s32 %s756_s11, %s286_s10  ;;  %s384_s15 = sshra.s32 %s745_s14, 3 }
  0x3c   :  { %v1146_v45 = vpack.c.bf16 %v88_v43, %v86_v42  ;;  %v1150_v48 = vpack.c.bf16 %v87_v47, %v85_v46  ;;  %v56_v59 = vld [vmem:[%s55_s27] ss:$8 sm:$0x3]  ;;  %s290_s13 = scalar_lea.vmem [#allocation4], %s289_s12  ;;  %s387_s16 = sand.u32 7, %s745_s14 }
  0x3d   :  { %771 = vmatpush1.bf16.msra.mxu0 %v1110_v20  ;;  %803 = vmatpush1.bf16.msra.mxu1 %v1110_v20  ;;  %v1188_v61 = vld [vmem:[%s1274_s3] sm:$0x3]  ;;  %s739_s3 = sld [smem:[#allocation3 + $0x1]]  ;;  %s757_s17 = sshll.u32 %s384_s15, 4 }
  0x3e   :  { %773 = vmatprep.subr.bf16.mxu0 %v1114_v21  ;;  %805 = vmatprep.subr.bf16.mxu1 %v1114_v21  ;;  %v291_v17 = vld [vmem:[%s290_s13] ss:$8 sm:$0x3]  ;;  %s390_s18 = sadd.s32 %s757_s17, %s387_s16  ;;  %s485_s21 = sshra.s32 %s748_s20, 3 }
  0x3f   :  { %s391_s19 = scalar_lea.vmem [#allocation4], %s390_s18  ;;  %s488_s1 = sand.u32 7, %s748_s20 }
  0x40   :  { %s758_s22 = sshll.u32 %s485_s21, 4  ;;  %s751_s24 = sld [smem:[#allocation3 + $0x5]] }
  0x41   :  { %775 = vmatpush1.bf16.msra.mxu0 %v1118_v26  ;;  %807 = vmatpush1.bf16.msra.mxu1 %v1118_v26  ;;  %s491_s2 = sadd.s32 %s758_s22, %s488_s1 }
  0x42   :  { %777 = vmatprep.subr.bf16.mxu0 %v1122_v27  ;;  %809 = vmatprep.subr.bf16.mxu1 %v1122_v27  ;;  %s492_s23 = scalar_lea.vmem [#allocation4], %s491_s2 }
  0x43   :  { %s182_s30 = sshra.s32 %s739_s3, 3  ;;  %s185_s5 = sand.u32 7, %s739_s3  ;;  %v493_v28 = vld [vmem:[%s492_s23] ss:$8 sm:$0x3] }
  0x44   :  { %s755_s6 = sshll.u32 %s182_s30, 4 }
  0x45   :  { %779 = vmatpush1.bf16.msra.mxu0 %v1126_v32  ;;  %811 = vmatpush1.bf16.msra.mxu1 %v1126_v32  ;;  %s188_s7 = sadd.s32 %s755_s6, %s185_s5 }
  0x46   :  { %781 = vmatprep.subr.bf16.mxu0 %v1130_v33  ;;  %813 = vmatprep.subr.bf16.mxu1 %v1130_v33  ;;  %s189_s0 = scalar_lea.vmem [#allocation4], %s188_s7  ;;  %s586_s25 = sshra.s32 %s751_s24, 3 }
  0x47   :  { %v190_v6 = vld [vmem:[%s189_s0] ss:$8 sm:$0x3]  ;;  %s589_s26 = sand.u32 7, %s751_s24  ;;  %s759_s27 = sshll.u32 %s586_s25, 4 }
  0x48   :  { %s592_s28 = sadd.s32 %s759_s27, %s589_s26 }
  0x49   :  { %783 = vmatpush1.bf16.msra.mxu0 %v1134_v38  ;;  %815 = vmatpush1.bf16.msra.mxu1 %v1134_v38  ;;  %s593_s29 = scalar_lea.vmem [#allocation4], %s592_s28 }
  0x4a   :  { %785 = vmatprep.subr.bf16.mxu0 %v1138_v39  ;;  %817 = vmatprep.subr.bf16.mxu1 %v1138_v39  ;;  %v594_v36 = vld [vmem:[%s593_s29] ss:$8 sm:$0x3] }
  0x4d   :  { %787 = vmatpush1.bf16.msra.mxu0 %v1142_v44  ;;  %819 = vmatpush1.bf16.msra.mxu1 %v1142_v44 }
  0x4e   :  { %789 = vmatprep.subr.bf16.mxu0 %v1146_v45  ;;  %821 = vmatprep.subr.bf16.mxu1 %v1146_v45 }
  0x51   :  { %791 = vmatpush1.bf16.msra.mxu0 %v1150_v48  ;;  %823 = vmatpush1.bf16.msra.mxu1 %v1150_v48 }
  0x52   :  { %825 = vmatprep.subr.bf16.mxu0 %v1093_v4  ;;  %857 = vmatprep.subr.bf16.mxu1 %v1093_v4 }
  0x54   :  { %154 = vmatmul.mubr.f32.vlgmr.msra.gmra.mrb[0].mxu0 %v1028_v0 }
  0x55   :  { %827 = vmatpush1.bf16.msra.mxu0 %v1095_v8  ;;  %356 = vmatprep.mubr.f32.mxu0 %v1028_v0 }
  0x56   :  { %829 = vmatprep.subr.bf16.mxu0 %v1097_v9 }
  0x59   :  { %831 = vmatpush1.bf16.msra.mxu0 %v1102_v14 }
  0x5a   :  { %833 = vmatprep.subr.bf16.mxu0 %v1106_v15 }
  0x5d   :  { %835 = vmatpush1.bf16.msra.mxu0 %v1110_v20 }
  0x5e   :  { %837 = vmatprep.subr.bf16.mxu0 %v1114_v21 }
  0x61   :  { %839 = vmatpush1.bf16.msra.mxu0 %v1118_v26 }
  0x62   :  { %841 = vmatprep.subr.bf16.mxu0 %v1122_v27 }
  0x65   :  { %843 = vmatpush1.bf16.msra.mxu0 %v1126_v32 }
  0x66   :  { %845 = vmatprep.subr.bf16.mxu0 %v1130_v33 }
  0x69   :  { %847 = vmatpush1.bf16.msra.mxu0 %v1134_v38 }
  0x6a   :  { %849 = vmatprep.subr.bf16.mxu0 %v1138_v39 }
  0x6d   :  { %851 = vmatpush1.bf16.msra.mxu0 %v1142_v44 }
  0x6e   :  { %853 = vmatprep.subr.bf16.mxu0 %v1146_v45 }
  0x71   :  { %855 = vmatpush1.bf16.msra.mxu0 %v1150_v48 }
  0x72   :  { %889 = vmatprep.subr.bf16.mxu0 %v1093_v4 }
 0x127   :  { %v155_v54 = vpop.f32.mrb[0].mxu0 }
 0x128   :  { %v157_v56 = vpop.f32.mrb[1].mxu0 }
 0x129   :  { %v162_v57 = vcombine.low %v155_v54, %v157_v56 }
 0x12b   :  { %v169_v58 = vrot.slane %v162_v57, %v1181_v55 }
 0x12d   :  { %v176_v60 = vrot.slane %v169_v58, %v1181_v55 }
 0x12f   :  { %v178_v62 = vadd.f32 %v176_v60, %v56_v59 }
 0x131   :  { %v180_v63 = vadd.f32 %v1188_v61, %v178_v62 }
 0x133   :  { %256 = vmatmul.mubr.f32.vlgmr.msra.gmra.mrb[0].mxu1 %v180_v63 }
 0x134   :  { %859 = vmatpush1.bf16.msra.mxu1 %v1095_v8  ;;  %457 = vmatprep.mubr.f32.mxu1 %v1028_v0 }
 0x135   :  { %861 = vmatprep.subr.bf16.mxu1 %v1097_v9 }
 0x138   :  { %863 = vmatpush1.bf16.msra.mxu1 %v1102_v14 }
 0x139   :  { %865 = vmatprep.subr.bf16.mxu1 %v1106_v15 }
 0x13c   :  { %867 = vmatpush1.bf16.msra.mxu1 %v1110_v20 }
 0x13d   :  { %869 = vmatprep.subr.bf16.mxu1 %v1114_v21 }
 0x140   :  { %871 = vmatpush1.bf16.msra.mxu1 %v1118_v26 }
 0x141   :  { %873 = vmatprep.subr.bf16.mxu1 %v1122_v27 }
 0x144   :  { %875 = vmatpush1.bf16.msra.mxu1 %v1126_v32 }
 0x145   :  { %877 = vmatprep.subr.bf16.mxu1 %v1130_v33 }
 0x148   :  { %879 = vmatpush1.bf16.msra.mxu1 %v1134_v38 }
 0x149   :  { %881 = vmatprep.subr.bf16.mxu1 %v1138_v39 }
 0x14c   :  { %883 = vmatpush1.bf16.msra.mxu1 %v1142_v44 }
 0x14d   :  { %885 = vmatprep.subr.bf16.mxu1 %v1146_v45 }
 0x150   :  { %887 = vmatpush1.bf16.msra.mxu1 %v1150_v48 }
 0x151   :  { %921 = vmatprep.subr.bf16.mxu1 %v1093_v4 }
 0x206   :  { %v257_v1 = vpop.f32.mrb[0].mxu1 }
 0x207   :  { %v259_v2 = vpop.f32.mrb[1].mxu1 }
 0x208   :  { %v264_v3 = vcombine.low %v257_v1, %v259_v2 }
 0x20a   :  { %v271_v5 = vrot.slane %v264_v3, %v1181_v55 }
 0x20c   :  { %v278_v7 = vrot.slane %v271_v5, %v1181_v55 }
 0x20e   :  { %v280_v10 = vadd.f32 %v278_v7, %v190_v6 }
 0x210   :  { %v281_v11 = vadd.f32 %v280_v10, %v1188_v61 }
 0x212   :  { %357 = vmatmul.mubr.f32.vlgmr.msra.gmra.mrb[2].mxu0 %v281_v11 }
 0x213   :  { %891 = vmatpush1.bf16.msra.mxu0 %v1095_v8  ;;  %558 = vmatprep.mubr.f32.mxu0 %v1028_v0 }
 0x214   :  { %893 = vmatprep.subr.bf16.mxu0 %v1097_v9 }
 0x217   :  { %895 = vmatpush1.bf16.msra.mxu0 %v1102_v14 }
 0x218   :  { %897 = vmatprep.subr.bf16.mxu0 %v1106_v15 }
 0x21b   :  { %899 = vmatpush1.bf16.msra.mxu0 %v1110_v20 }
 0x21c   :  { %901 = vmatprep.subr.bf16.mxu0 %v1114_v21 }
 0x21f   :  { %903 = vmatpush1.bf16.msra.mxu0 %v1118_v26 }
 0x220   :  { %905 = vmatprep.subr.bf16.mxu0 %v1122_v27 }
 0x223   :  { %907 = vmatpush1.bf16.msra.mxu0 %v1126_v32 }
 0x224   :  { %909 = vmatprep.subr.bf16.mxu0 %v1130_v33 }
 0x227   :  { %911 = vmatpush1.bf16.msra.mxu0 %v1134_v38 }
 0x228   :  { %913 = vmatprep.subr.bf16.mxu0 %v1138_v39 }
 0x22b   :  { %915 = vmatpush1.bf16.msra.mxu0 %v1142_v44 }
 0x22c   :  { %917 = vmatprep.subr.bf16.mxu0 %v1146_v45 }
 0x22f   :  { %919 = vmatpush1.bf16.msra.mxu0 %v1150_v48 }
 0x2e5   :  { %v358_v4 = vpop.f32.mrb[2].mxu0 }
 0x2e6   :  { %v360_v12 = vpop.f32.mrb[3].mxu0 }
 0x2e7   :  { %v365_v13 = vcombine.low %v358_v4, %v360_v12 }
 0x2e9   :  { %v372_v16 = vrot.slane %v365_v13, %v1181_v55 }
 0x2eb   :  { %v379_v18 = vrot.slane %v372_v16, %v1181_v55 }
 0x2ed   :  { %v381_v19 = vadd.f32 %v379_v18, %v291_v17 }
 0x2ef   :  { %v382_v22 = vadd.f32 %v381_v19, %v1188_v61 }
 0x2f1   :  { %458 = vmatmul.mubr.f32.vlgmr.msra.gmra.mrb[2].mxu1 %v382_v22 }
 0x2f2   :  { %923 = vmatpush1.bf16.msra.mxu1 %v1095_v8  ;;  %659 = vmatprep.mubr.f32.mxu1 %v1028_v0 }
 0x2f3   :  { %925 = vmatprep.subr.bf16.mxu1 %v1097_v9 }
 0x2f6   :  { %927 = vmatpush1.bf16.msra.mxu1 %v1102_v14 }
 0x2f7   :  { %929 = vmatprep.subr.bf16.mxu1 %v1106_v15  ;;  %v392_v15 = vld [vmem:[%s391_s19] ss:$8 sm:$0x3] }
 0x2fa   :  { %931 = vmatpush1.bf16.msra.mxu1 %v1110_v20 }
 0x2fb   :  { %933 = vmatprep.subr.bf16.mxu1 %v1114_v21 }
 0x2fe   :  { %935 = vmatpush1.bf16.msra.mxu1 %v1118_v26 }
 0x2ff   :  { %937 = vmatprep.subr.bf16.mxu1 %v1122_v27 }
 0x302   :  { %939 = vmatpush1.bf16.msra.mxu1 %v1126_v32 }
 0x303   :  { %941 = vmatprep.subr.bf16.mxu1 %v1130_v33 }
 0x306   :  { %943 = vmatpush1.bf16.msra.mxu1 %v1134_v38 }
 0x307   :  { %945 = vmatprep.subr.bf16.mxu1 %v1138_v39  ;;  %v689_v39 = vsub.s32 1, %v1178_v53 }
 0x30a   :  { %947 = vmatpush1.bf16.msra.mxu1 %v1142_v44 }
 0x30b   :  { %949 = vmatprep.subr.bf16.mxu1 %v1146_v45 }
 0x30e   :  { %951 = vmatpush1.bf16.msra.mxu1 %v1150_v48 }
 0x3c4   :  { %v459_v0 = vpop.f32.mrb[2].mxu1 }
 0x3c5   :  { %v461_v8 = vpop.f32.mrb[3].mxu1 }
 0x3c6   :  { %v466_v9 = vcombine.low %v459_v0, %v461_v8 }
 0x3c8   :  { %v473_v14 = vrot.slane %v466_v9, %v1181_v55 }
 0x3ca   :  { %v480_v20 = vrot.slane %v473_v14, %v1181_v55 }
 0x3cc   :  { %v482_v21 = vadd.f32 %v480_v20, %v392_v15 }
 0x3ce   :  { %v483_v23 = vadd.f32 %v482_v21, %v1188_v61 }
 0x3d0   :  { %559 = vmatmul.mubr.f32.vlgmr.msra.gmra.mrb[4].mxu0 %v483_v23 }
 0x4a3   :  { %v560_v24 = vpop.f32.mrb[4].mxu0 }
 0x4a4   :  { %v562_v25 = vpop.f32.mrb[5].mxu0 }
 0x4a5   :  { %v567_v26 = vcombine.low %v560_v24, %v562_v25 }
 0x4a7   :  { %v574_v27 = vrot.slane %v567_v26, %v1181_v55 }
 0x4a9   :  { %v581_v29 = vrot.slane %v574_v27, %v1181_v55 }
 0x4ab   :  { %v583_v30 = vadd.f32 %v581_v29, %v493_v28 }
 0x4ad   :  { %v584_v31 = vadd.f32 %v583_v30, %v1188_v61 }
 0x4af   :  { %660 = vmatmul.mubr.f32.vlgmr.msra.gmra.mrb[4].mxu1 %v584_v31 }
 0x582   :  { %v661_v32 = vpop.f32.mrb[4].mxu1 }
 0x583   :  { %v663_v33 = vpop.f32.mrb[5].mxu1 }
 0x584   :  { %v668_v34 = vcombine.low %v661_v32, %v663_v33 }
 0x586   :  { %v675_v35 = vrot.slane %v668_v34, %v1181_v55 }
 0x588   :  { %v682_v37 = vrot.slane %v675_v35, %v1181_v55 }
 0x58a   :  { %v684_v38 = vadd.f32 %v682_v37, %v594_v36 }
 0x58c   :  { %v685_v41 = vadd.f32 %v684_v38, %v1188_v61 }
 0x58e   :  { %v690_v42 = vrot.slane %v685_v41, %v689_v39  ;;  %710 = vst.msk [vmem:[%s1275_s4] sm:$0x1] %vm1256_vm0, %v685_v41  ;;  %v696_v44 = vrot.slane %v685_v41, 1 }
 0x590   :  { %v693_v43 = vsel %vm692_vm1, %v690_v42, -inf }
 0x591   :  { %694 = vmax.xlane.f32.xlu0 %v693_v43 }
 0x61e   :  { %v695_v45 = vpop.xlane.xlu0 %694 }
 0x61f   :  { %v698_v46 = vsub.f32 %v696_v44, %v695_v45 }
 0x621   :  { %v699_v47 = vmul.f32 1.442695, %v698_v46 }
 0x623   :  { %959 = vpow2.f32 %v699_v47 }
 0x62d   :  { %v960_v48 = vpop.eup %959 }
 0x62e   :  { %v701_v49 = vsel %vm692_vm1, %v960_v48, 0.0 }
 0x62f   :  { %702 = vadd.xlane.f32.xlu0 %v701_v49 }
 0x6bc   :  { %v703_v50 = vpop.xlane.xlu0 %702 }
 0x6bd   :  { %961 = vlog2.f32 %v703_v50 }
 0x6c7   :  { %v962_v51 = vpop.eup %961 }
 0x6c8   :  { %v705_v52 = vmul.f32 0.6931472, %v962_v51 }
 0x6ca   :  { %v711_v53 = vsub.f32 %v698_v46, %v705_v52 }
 0x6cc   :  { %712 = vst.msk [vmem:[%s1275_s4 + $0x1] sm:$0x1] %vm1256_vm0, %v711_v53 }
 0x6cd   :  { %717 = vsyncpa [#allocation5], 1 }
 0x6ce   :  { %718 = vsyncpa [#allocation7], 1 }

</bundles_post_ra>
